<compile_context>
chip_gen: v7x
topology: tpu7x:2x2x1
jax: 0.10.0
libtpu: 0.0.40
codegen_flags: <defaults>
</compile_context>

<pallas_src>
import functools

import numpy as np
import jax
import jax.numpy as jnp
from jax.experimental import pallas as pl
from jax.experimental.pallas import tpu as pltpu

K_PAD = 8           # num_class+1 = 5 padded to 8 sublanes (transposed, lane-dense output)
MAX_TILE_P = 2048   # pixels (lanes) per grid step -- VMEM-friendly upper bound


def _round_up(n, m):
    return ((n + m - 1) // m) * m


def _pick_tile_p(n_pix, max_tile=MAX_TILE_P):
    """Largest multiple-of-128 divisor of n_pix <= max_tile that still leaves
    >= 2 tiles (megacore sharding on v7x); small/awkward sizes fall back to a
    single full-extent block (allowed by the (8,128) rule)."""
    if n_pix % 128 != 0 or n_pix <= 256:
        return n_pix
    best = 128
    for t in range(128, min(max_tile, n_pix // 2) + 1, 128):
        if n_pix % t == 0:
            best = t
    return best


# ----------------------------------------------------------------------------
# Fused segmentation-head kernel (GEMM1 -> ReLU -> exact TTA mean -> GEMM2)
# ----------------------------------------------------------------------------

def _head_kernel(pt_ref, w1t_ref, b1t_ref, w2t_ref, b2t_ref, out_ref, *,
                 hidden, n_aug):
    """Transposed orientation: pixels on lanes throughout.

    pt_ref  : (F_pad, TILE_P)        bf16  im2col patches^T
    w1t_ref : (n_aug*hidden, F_pad)  bf16  concatenated tap-permuted conv weights^T
    b1t_ref : (n_aug*hidden, 1)      f32
    w2t_ref : (K_PAD, hidden)        bf16  shared 1x1-conv weights^T
    b2t_ref : (K_PAD, 1)             f32
    out_ref : (K_PAD, TILE_P)        f32   TTA-mean logits^T
    """
    # GEMM1 over ALL TTA passes at once: (n_aug*hidden, F) @ (F, P), f32 acc.
    h = jnp.dot(w1t_ref[...], pt_ref[...], preferred_element_type=jnp.float32)
    h = jnp.maximum(h + b1t_ref[...], 0.0)

    # Exact TTA-mean collapse (W2/b2 shared): average the n_aug hidden chunks.
    hm = h[0:hidden, :]
    for a in range(1, n_aug):
        hm = hm + h[a * hidden:(a + 1) * hidden, :]
    hm = hm * (1.0 / n_aug)

    # GEMM2 (shared head): (K_PAD, hidden) @ (hidden, P), f32 acc.
    o = jnp.dot(w2t_ref[...], hm.astype(w2t_ref.dtype),
                preferred_element_type=jnp.float32)
    out_ref[...] = o + b2t_ref[...]


def head_forward(patches_t, w1t, b1t, w2t, b2t, *, hidden, n_aug):
    feat, n_pix = patches_t.shape
    tile_p = _pick_tile_p(n_pix)
    kern = functools.partial(_head_kernel, hidden=hidden, n_aug=n_aug)
    return pl.pallas_call(
        kern,
        grid=(n_pix // tile_p,),
        in_specs=[
            pl.BlockSpec((feat, tile_p), lambda i: (0, i)),   # streamed pixel tiles
            pl.BlockSpec(w1t.shape, lambda i: (0, 0)),        # tiny resident weights
            pl.BlockSpec(b1t.shape, lambda i: (0, 0)),
            pl.BlockSpec(w2t.shape, lambda i: (0, 0)),
            pl.BlockSpec(b2t.shape, lambda i: (0, 0)),
        ],
        out_specs=pl.BlockSpec((K_PAD, tile_p), lambda i: (0, i)),
        out_shape=jax.ShapeDtypeStruct((K_PAD, n_pix), jnp.float32),
        compiler_params=pltpu.CompilerParams(
            dimension_semantics=("parallel",)),
    )(patches_t, w1t, b1t, w2t, b2t)           # -> (K_PAD, H*W) logits^T


def _im2col_T(x_chw, feat_pad):
    """(C,H,W) -> lane-aligned im2col^T slab (feat_pad, H*W) bf16.

    Built once per image in the wrapper (review option (b)): the kernel then
    only sees lane-dense blocks -- no C-minor layout / in-kernel 9-way concat."""
    c, h, w = x_chw.shape
    xp = jnp.pad(x_chw.astype(jnp.bfloat16), ((0, 0), (1, 1), (1, 1)))
    taps = [xp[:, dy:dy + h, dx:dx + w].reshape(c, h * w)
            for dy in range(3) for dx in range(3)]
    pt = jnp.concatenate(taps, axis=0)                       # (9C, H*W)
    return jnp.pad(pt, ((0, feat_pad - 9 * c), (0, 0)))      # (feat_pad, H*W) bf16


# ----------------------------------------------------------------------------
# Bilinear resize kernel (F.interpolate, align_corners=False), per-channel grid
# ----------------------------------------------------------------------------

def _bilinear_kernel(y_ref, ah_ref, awt_ref, out_ref):
    """One channel per grid step: out_c = Ah @ y_c @ Aw^T (bf16 operands, f32 acc)."""
    t = jnp.dot(ah_ref[...], y_ref[0], preferred_element_type=jnp.float32)
    out_ref[0] = jnp.dot(t.astype(awt_ref.dtype), awt_ref[...],
                         preferred_element_type=jnp.float32)


def _bilinear_matrix(out_size, in_size):
    """torch F.interpolate(mode='bilinear', align_corners=False) weights."""
    A = np.zeros((out_size, in_size), dtype=np.float32)
    scale = in_size / out_size
    for i in range(out_size):
        src = max((i + 0.5) * scale - 0.5, 0.0)
        x0 = min(int(np.floor(src)), in_size - 1)
        x1 = min(x0 + 1, in_size - 1)
        frac = src - x0
        A[i, x0] += 1.0 - frac
        A[i, x1] += frac
    return A


def bilinear_resize(y_khw, ah, awt):
    k, h_in, w_in = y_khw.shape
    h_out, w_out = ah.shape[0], awt.shape[1]
    return pl.pallas_call(
        _bilinear_kernel,
        grid=(k,),
        in_specs=[
            pl.BlockSpec((1, h_in, w_in), lambda c: (c, 0, 0)),
            pl.BlockSpec(ah.shape, lambda c: (0, 0)),
            pl.BlockSpec(awt.shape, lambda c: (0, 0)),
        ],
        out_specs=pl.BlockSpec((1, h_out, w_out), lambda c: (c, 0, 0)),
        out_shape=jax.ShapeDtypeStruct((k, h_out, w_out), jnp.float32),
        compiler_params=pltpu.CompilerParams(
            dimension_semantics=("parallel",)),
    )(y_khw.astype(jnp.bfloat16), ah, awt)


# ----------------------------------------------------------------------------
# TTA as tap permutations of the 3x3 conv kernel
# ----------------------------------------------------------------------------
# For a conv head, deaug(head(aug(x))) == head with spatially permuted 3x3 taps
# on the ORIGINAL image (exact incl. the zero padding) for flips / +-90
# rotations of a square image.  Rotation direction re-derived: aug = rotate -90
# (cw), deaug = rotate +90 (acw)  =>  w'[ty,tx] = w[tx, 2-ty] == rot90(w, k=1).
_TTA_TAP_PERMS = (
    lambda w: w,                               # identity_trfm
    lambda w: w[:, ::-1],                      # horizontal_flip (self-inverse)
    lambda w: w[::-1, :],                      # vertical_flip   (self-inverse)
    lambda w: jnp.rot90(w, k=1, axes=(0, 1)),  # rotate_cw aug + rotate_acw deaug
    lambda w: w,  # TODO(synk): pixel-level TTA (HueSaturationValue /
                  # RandomBrightnessContrast) is random colour jitter with no
                  # deterministic Pallas equivalent; identity fills its slot.
)


# ----------------------------------------------------------------------------
# EnsembleModel
# ----------------------------------------------------------------------------

class EnsembleModel:
    """JAX/Pallas re-implementation of inference.EnsembleModel.forward.

    The real pretrained backbones are replaced by deterministic synthetic
    segmentation heads (3x3 conv + ReLU + 1x1 conv -> num_class+1 logits);
    the TTA / interpolate / ensemble-mean structure of forward() is preserved."""

    def __init__(self, model_names, img_size=32, num_channels=6,
                 num_class=4, hidden=32, tta=True):
        self.model_names = list(model_names)
        self.img_size = img_size              # analogue of the hard-coded (320, 320)
        self.tta = tta                        # CFG.TTA
        self.num_classes = num_class + 1
        self.hidden = hidden
        self.n_aug = len(_TTA_TAP_PERMS)
        self.feat_pad = _round_up(9 * num_channels, 8)
        assert self.num_classes <= K_PAD

        self.params = []
        for i, _ in enumerate(self.model_names):
            k1, k2, k3, k4 = jax.random.split(jax.random.PRNGKey(100 + i), 4)
            w1 = 0.1 * jax.random.normal(k1, (3, 3, num_channels, hidden), jnp.float32)
            b1 = 0.01 * jax.random.normal(k2, (1, hidden), jnp.float32)
            w2 = 0.1 * jax.random.normal(k3, (hidden, self.num_classes), jnp.float32)
            b2 = 0.01 * jax.random.normal(k4, (1, self.num_classes), jnp.float32)

            def w1t_of(perms, w1=w1):
                blocks = [perm(w1).reshape(9 * num_channels, hidden).T for perm in perms]
                w1t = jnp.concatenate(blocks, axis=0)                  # (n*hidden, 9C)
                w1t = jnp.pad(w1t, ((0, 0), (0, self.feat_pad - 9 * num_channels)))
                return w1t.astype(jnp.bfloat16)

            w2t = jnp.zeros((K_PAD, hidden), jnp.float32)
            w2t = w2t.at[:self.num_classes, :].set(w2.T).astype(jnp.bfloat16)
            b2t = jnp.zeros((K_PAD, 1), jnp.float32)
            b2t = b2t.at[:self.num_classes, 0].set(b2[0])

            self.params.append(dict(
                w1t_tta=w1t_of(_TTA_TAP_PERMS),       # (5*hidden, feat_pad) bf16
                w1t_one=w1t_of(_TTA_TAP_PERMS[:1]),   # (hidden,   feat_pad) bf16
                b1t_tta=jnp.tile(b1.T, (self.n_aug, 1)),
                b1t_one=b1.T,
                w2t=w2t, b2t=b2t))

        # Bilinear-resize matrices hoisted off the per-call path (built once).
        if "segformer" in self.model_names:
            f = 4
            hs, ws = img_size // f, img_size // f
            self._ah = jnp.asarray(_bilinear_matrix(img_size, hs)).astype(jnp.bfloat16)
            self._awt = jnp.asarray(_bilinear_matrix(img_size, ws).T).astype(jnp.bfloat16)

    def _run_head(self, p, x_chw, *, tta):
        _, h, w = x_chw.shape
        patches_t = _im2col_T(x_chw, self.feat_pad)
        if tta:
            flat = head_forward(patches_t, p["w1t_tta"], p["b1t_tta"],
                                p["w2t"], p["b2t"],
                                hidden=self.hidden, n_aug=self.n_aug)
        else:
            flat = head_forward(patches_t, p["w1t_one"], p["b1t_one"],
                                p["w2t"], p["b2t"],
                                hidden=self.hidden, n_aug=1)
        # only the 5 useful sublane rows of the (8, H*W) slab are touched here
        return flat[:self.num_classes].reshape(self.num_classes, h, w)

    def __call__(self, x):                    # x: (1, C, H, W), NCHW
        # reference: inputs = x.permute(2, 3, 1, 0).squeeze()  -> batch == 1
        x_chw = x[0]
        c, h, w = x_chw.shape
        outputs = []
        for p, model_name in zip(self.params, self.model_names):
            if self.tta and model_name != "segformer":
                # all 5 TTA passes + TTA mean collapsed into one wide GEMM; the
                # geometric aug/de-aug lives in the tap-permuted W1 blocks.
                out_ = self._run_head(p, x_chw, tta=True)[None]           # (1,K,H,W)
            elif model_name == "segformer":
                # synthetic 'segformer': 4x avg-pool stem -> head -> bilinear up
                f = 4
                x_ds = x_chw.reshape(c, h // f, f, w // f, f).mean(axis=(2, 4))
                low = self._run_head(p, x_ds, tta=False)                  # (K,H/4,W/4)
                out_ = bilinear_resize(low, self._ah, self._awt)[None]    # (1,K,H,W)
            else:
                out_ = self._run_head(p, x_chw, tta=False)[None]
            outputs.append(out_)
        # ensemble mean over M models (tiny) -> plain JAX, no extra kernel
        return sum(outputs) / len(outputs)


# ----------------------------------------------------------------------------
# Demo
# ----------------------------------------------------------------------------

if __name__ == "__main__":
    # CFG.use_vi_inf=True -> 6 channels; the TTA `.squeeze()` implies batch N=1.
    N, C, H, W = 1, 6, 32, 32
    x = jax.random.normal(jax.random.PRNGKey(0), (N, C, H, W), dtype=jnp.float32)

    model = EnsembleModel(model_names=["segformer", "UNetPlusPlus"],
                          img_size=H, num_channels=C, num_class=4,
                          hidden=32, tta=True)
    out = jax.block_until_ready(model(x))

    assert out.shape == (1, 5, H, W), out.shape
    assert bool(jnp.all(jnp.isfinite(out)))
    print("KERNEL_OK")
</pallas_src>

<mosaic_0001>
module attributes {stable_mosaic.version = 11 : i64} {
  func.func @_head_kernel(%arg0: i32, %arg1: memref<56x64xbf16, #tpu.memory_space<vmem>>, %arg2: memref<32x56xbf16, #tpu.memory_space<vmem>>, %arg3: memref<32x1xf32, #tpu.memory_space<vmem>>, %arg4: memref<8x32xbf16, #tpu.memory_space<vmem>>, %arg5: memref<8x1xf32, #tpu.memory_space<vmem>>, %arg6: memref<8x64xf32, #tpu.memory_space<vmem>>) attributes {dimension_semantics = [#tpu.dimension_semantics<parallel>], iteration_bounds = array<i64: 1>, scalar_prefetch = 0 : i64, scratch_operands = 0 : i64, tpu.core_type = #tpu.core_type<tc>, window_params = [{transform_indices = @transform_0, window_bounds = array<i64: 56, 64>}, {pipeline_mode = #tpu.pipeline_mode<synchronous>, transform_indices = @transform_1, window_bounds = array<i64: 32, 56>}, {pipeline_mode = #tpu.pipeline_mode<synchronous>, transform_indices = @transform_2, window_bounds = array<i64: 32, 1>}, {pipeline_mode = #tpu.pipeline_mode<synchronous>, transform_indices = @transform_3, window_bounds = array<i64: 8, 32>}, {pipeline_mode = #tpu.pipeline_mode<synchronous>, transform_indices = @transform_4, window_bounds = array<i64: 8, 1>}, {transform_indices = @transform_5, window_bounds = array<i64: 8, 64>}]} {
    %c0 = arith.constant 0 : index
    %c0_0 = arith.constant 0 : index
    %0 = vector.load %arg2[%c0, %c0_0] : memref<32x56xbf16, #tpu.memory_space<vmem>>, vector<32x56xbf16>
    %c0_1 = arith.constant 0 : index
    %c0_2 = arith.constant 0 : index
    %1 = vector.load %arg1[%c0_1, %c0_2] : memref<56x64xbf16, #tpu.memory_space<vmem>>, vector<56x64xbf16>
    %cst = arith.constant dense<0.000000e+00> : vector<32x64xf32>
    %2 = tpu.matmul %0, %1, %cst {dimension_numbers = #tpu.dot_dimension_numbers<[1], [0], [0], [1], [0, 0, 1, 1], [], []>} : vector<32x56xbf16>, vector<56x64xbf16>, vector<32x64xf32> -> vector<32x64xf32>
    %c0_3 = arith.constant 0 : index
    %c0_4 = arith.constant 0 : index
    %3 = vector.load %arg3[%c0_3, %c0_4] : memref<32x1xf32, #tpu.memory_space<vmem>>, vector<32x1xf32>
    %4 = vector.broadcast %3 : vector<32x1xf32> to vector<32x64xf32>
    %5 = arith.addf %2, %4 : vector<32x64xf32>
    %cst_5 = arith.constant 0.000000e+00 : f32
    %6 = vector.broadcast %cst_5 : f32 to vector<32x64xf32>
    %7 = arith.maximumf %5, %6 : vector<32x64xf32>
    %cst_6 = arith.constant 1.000000e+00 : f32
    %8 = vector.broadcast %cst_6 : f32 to vector<32x64xf32>
    %9 = arith.mulf %7, %8 : vector<32x64xf32>
    %c0_7 = arith.constant 0 : index
    %c0_8 = arith.constant 0 : index
    %10 = vector.load %arg4[%c0_7, %c0_8] : memref<8x32xbf16, #tpu.memory_space<vmem>>, vector<8x32xbf16>
    %11 = arith.truncf %9 : vector<32x64xf32> to vector<32x64xbf16>
    %cst_9 = arith.constant dense<0.000000e+00> : vector<8x64xf32>
    %12 = tpu.matmul %10, %11, %cst_9 {dimension_numbers = #tpu.dot_dimension_numbers<[1], [0], [0], [1], [0, 0, 1, 1], [], []>} : vector<8x32xbf16>, vector<32x64xbf16>, vector<8x64xf32> -> vector<8x64xf32>
    %c0_10 = arith.constant 0 : index
    %c0_11 = arith.constant 0 : index
    %13 = vector.load %arg5[%c0_10, %c0_11] : memref<8x1xf32, #tpu.memory_space<vmem>>, vector<8x1xf32>
    %14 = vector.broadcast %13 : vector<8x1xf32> to vector<8x64xf32>
    %15 = arith.addf %12, %14 : vector<8x64xf32>
    %c0_12 = arith.constant 0 : index
    %c0_13 = arith.constant 0 : index
    %16 = vector.load %arg6[%c0_12, %c0_13] : memref<8x64xf32, #tpu.memory_space<vmem>>, vector<8x64xf32>
    tpu.vector_store %arg6[%c0_12, %c0_13], %15 {strides = array<i32>} : memref<8x64xf32, #tpu.memory_space<vmem>>, vector<8x64xf32>,
    return
  }
  func.func @transform_0(%arg0: i32) -> (i32, i32) {
    %c0_i32 = arith.constant 0 : i32
    %c0_i32_0 = arith.constant 0 : i32
    return %c0_i32, %arg0 : i32, i32
  }
  func.func @transform_1(%arg0: i32) -> (i32, i32) {
    %c0_i32 = arith.constant 0 : i32
    %c0_i32_0 = arith.constant 0 : i32
    %c0_i32_1 = arith.constant 0 : i32
    return %c0_i32, %c0_i32_0 : i32, i32
  }
  func.func @transform_2(%arg0: i32) -> (i32, i32) {
    %c0_i32 = arith.constant 0 : i32
    %c0_i32_0 = arith.constant 0 : i32
    %c0_i32_1 = arith.constant 0 : i32
    return %c0_i32, %c0_i32_0 : i32, i32
  }
  func.func @transform_3(%arg0: i32) -> (i32, i32) {
    %c0_i32 = arith.constant 0 : i32
    %c0_i32_0 = arith.constant 0 : i32
    %c0_i32_1 = arith.constant 0 : i32
    return %c0_i32, %c0_i32_0 : i32, i32
  }
  func.func @transform_4(%arg0: i32) -> (i32, i32) {
    %c0_i32 = arith.constant 0 : i32
    %c0_i32_0 = arith.constant 0 : i32
    %c0_i32_1 = arith.constant 0 : i32
    return %c0_i32, %c0_i32_0 : i32, i32
  }
  func.func @transform_5(%arg0: i32) -> (i32, i32) {
    %c0_i32 = arith.constant 0 : i32
    %c0_i32_0 = arith.constant 0 : i32
    return %c0_i32, %arg0 : i32, i32
  }
}

</mosaic_0001>

<bundles_post_ra>
// kernel: tpu_custom_call.1
= control target key start
LH: loop header
LB: loop body
LE: loop exit
PB: predicated region body
PF: predicated region fallthrough
CT: control target
= control target key end

     0   :  { %vm88_vm0 = vcmask 457728   ;;  %v296_v3 = vmov 0   ;;  %s380_s0 = inlined_call_operand.vmem [shape: bf16[56,64], index: 0, kind: input, shape index: {}]   ;;  %s381_s1 = inlined_call_operand.vmem [shape: bf16[32,56], index: 1, kind: input, shape index: {}]   ;;  %s382_s2 = inlined_call_operand.vmem [shape: f32[32,1], index: 2, kind: input, shape index: {}]   ;;  %s383_s3 = inlined_call_operand.vmem [shape: bf16[8,32], index: 3, kind: input, shape index: {}]   ;;  %s384_s4 = inlined_call_operand.vmem [shape: f32[8,1], index: 4, kind: input, shape index: {}]   ;;  %s385_s5 = inlined_call_operand.hbm [shape: f32[8,64], index: 5, kind: output, shape index: {}]  }
   0x1   :  { %v266_v0 = vld [vmem:[%s380_s0] sm:$0xff]   ;;  %v267_v1 = vld [vmem:[%s380_s0 + $0x8] sm:$0xff]   ;;  %v268_v2 = vld [vmem:[%s380_s0 + $0x10] sm:$0xff]   ;;  %264 = vset.pattern.permute.xlu0 %v296_v3  ;;  %265 = vset.pattern.permute.xlu1 %v296_v3 }
   0x2   :  { %239 = vmatprep.subr.bf16.mxu0 %v266_v0  ;;  %v270_v4 = vld [vmem:[%s381_s1] sm:$0xff]   ;;  %v35_v6 = vld [vmem:[%s382_s2 + $0x10] sm:$0xff]  ;;  %v34_v7 = vld [vmem:[%s382_s2 + $0x8] sm:$0xff] }
   0x3   :  { %240 = vmatpush3.bf16.msra.mxu0 %v266_v0  ;;  %v33_v5 = vld [vmem:[%s382_s2] sm:$0xff]  ;;  %247 = vmatprep.mubr.msk.bf16.mxu0 %vm88_vm0, %v270_v4 }
   0x4   :  { %241 = vmatprep.subr.bf16.mxu0 %v267_v1  ;;  %39 = vperm.xlu0 %264, %v33_v5  }
   0x5   :  { %49 = vperm.xlu1 %265, %v35_v6  }
   0x7   :  { %242 = vmatpush3.bf16.msra.mxu0 %v267_v1 }
   0x8   :  { %10 = vsyncpa [#allocation3], 0  ;;  %243 = vmatprep.subr.bf16.mxu0 %v268_v2  ;;  %v269_v8 = vld [vmem:[%s380_s0 + $0x18] ss:$0 sps:$4 sm:$0xff]   ;;  %vm95_vm1 = vcmask 1043456   ;;  %44 = vperm.xlu0 %264, %v34_v7   ;;  %v155_v10 = vld [vmem:[%s384_s4] sm:$0xff] }
   0x9   :  { %v36_v9 = vld [vmem:[%s382_s2 + $0x18] sm:$0xff]  ;;  %v97_v11 = vsel %vm95_vm1, %v269_v8, 0  ;;  %v271_v12 = vld [vmem:[%s381_s1 + $0x8] sm:$0xff]   ;;  %v297_v13 = vmov 0.0   ;;  %vm298_vm2 = vmmov 0   ;;  %vm161_vm3 = vcmask 261120  }
   0xa   :  { %54 = vperm.xlu1 %265, %v36_v9   ;;  %251 = vmatprep.subr.bf16.mxu1 %v297_v13  ;;  %v152_v32 = vld [vmem:[%s383_s3] sm:$0xf]  ;;  %s299_s2 = smov [#allocation2]   ;;  %vm205_vm4 = vcmask 523264  }
   0xb   :  { %244 = vmatpush3.bf16.msra.mxu0 %v268_v2  ;;  %255 = vmatprep.mubr.msk.bf16.mxu1 %vm298_vm2, %v297_v13  ;;  %s213_s4 = sshll.u32 %s299_s2, 4  ;;  %s214_s4 = int_to_ptr.vmem [resolvable:$true] %s213_s4 }
   0xc   :  { %259 = vmatprep.subr.msk.bf16.mxu0 %vm95_vm1, %v269_v8  ;;  %158 = vperm.xlu0 %264, %v155_v10   ;;  %s272_s15 = scalar_lea.vmem %s214_s4, 128  ;;  %p277_p1 = scmp.lt.s32.totalorder %s214_s4, %s214_s4 }
   0xd   :  { %p273_p0 = scmp.ne.s32.totalorder %s214_s4, %s272_s15  ;;  %p278_p2 = scmp.lt.s32.totalorder %s272_s15, %s272_s15 }
   0xf   :  { %246 = vmatpush3.bf16.msra.mxu0 %v97_v11  ;;  %p279_p3 = por %p278_p2, %p277_p1 }
  0x11   :  { %p280_p4 = pnand %p279_p3, %p273_p0 }
  0x12   :  { %248 = vmatmul.mubr.msk.bf16.vlgmr.msra.gmra.mrb[0].mxu0 %vm88_vm0, %v271_v12 }
  0x83   :  { %v40_v15 = vpop.permute.xlu0 %39 }
  0x84   :  { %v50_v14 = vpop.permute.xlu1 %49 }
  0x87   :  { %v45_v22 = vpop.permute.xlu0 %44 }
  0x89   :  { %v55_v17 = vpop.permute.xlu1 %54 }
  0x8b   :  { %v159_v33 = vpop.permute.xlu0 %158 }
  0xe5   :  { %v249_v16 = vpop.f32.mrb[0].mxu0 }
  0xe6   :  { %v142_v18 = vadd.f32 %v249_v16, %v50_v14  ;;  %v133_v19 = vpop.f32.mrb[1].mxu0 }
  0xe7   :  { %v134_v20 = vadd.f32 %v133_v19, %v40_v15  ;;  %v250_v21 = vpop.f32.mrb[2].mxu0 }
  0xe8   :  { %v145_v23 = vadd.f32 %v250_v21, %v55_v17  ;;  %v136_v24 = vpop.f32.mrb[3].mxu0  ;;  %v150_v26 = vmax.f32 %v142_v18, 0.0 }
  0xe9   :  { %v137_v25 = vadd.f32 %v136_v24, %v45_v22  ;;  %v148_v28 = vmax.f32 %v134_v20, 0.0 }
  0xea   :  { %v151_v27 = vmax.f32 %v145_v23, 0.0 }
  0xeb   :  { %v149_v29 = vmax.f32 %v137_v25, 0.0 }
  0xec   :  { %v154_v30 = vpack.c.bf16 %v151_v27, %v150_v26 }
  0xed   :  { %v153_v31 = vpack.c.bf16 %v149_v29, %v148_v28 }
  0xef   :  { %252 = vmatpush3.bf16.msra.mxu1 %v153_v31 }
  0xf0   :  { %253 = vmatprep.subr.bf16.mxu1 %v297_v13 }
  0xf3   :  { %254 = vmatpush3.bf16.msra.mxu1 %v154_v30 }
  0xf6   :  { %256 = vmatmul.mubr.msk.bf16.vlgmr.msra.gmra.mrb[0].mxu1 %vm161_vm3, %v152_v32 }
 0x1c9   :  { %v199_v34 = vpop.f32.mrb[0].mxu1 }
 0x1ca   :  { %v200_v35 = vadd.f32 %v199_v34, %v159_v33  ;;  %v257_v36 = vpop.f32.mrb[1].mxu1 }
 0x1cb   :  { %v202_v37 = vpop.f32.mrb[2].mxu1 }
 0x1cc   :  { %v258_v38 = vpop.f32.mrb[3].mxu1  ;;  %206 = vst.msk [vmem:[#allocation2] sm:$0xff] %vm205_vm4, %v200_v35 }
 0x1cd   :  { %283 = shalt.err (!%p280_p4)
}
 0x1ce   :  { %s284_s17 = scalar_lea.hbm %s385_s5, 128 }
 0x1cf   :  { %p285_p5 = scmp.ne.s32.totalorder %s385_s5, %s284_s17  ;;  %p288_p6 = scmp.lt.u32.totalorder %s284_s17, %s385_s5 }
 0x1d1   :  { %p290_p7 = pnand %p288_p6, %p285_p5 }
 0x1d3   :  { %293 = shalt.err (!%p290_p7)
}
 0x1d4   :  { %216 = dma.vmem_to_hbm [thread:$0]  %s214_s4, 128, %s385_s5, [#allocation3]  }
 0x1d5   :  { %294 = dma.done.wait [#allocation3], 128  }
 0x1d6   :  { %295 = vsyncadd [#allocation3], 4294967168 }
 0x1d7   :  { %220 = vsyncpa [#allocation3], 1 }

</bundles_post_ra>
